<compile_context>
chip_gen: v7x
topology: tpu7x:2x2x1
jax: 0.10.0
libtpu: 0.0.40
codegen_flags: <defaults>
</compile_context>

<pallas_src>
import functools
import math

import numpy as np
import jax
import jax.numpy as jnp
from jax import lax
from jax.experimental import pallas as pl
from jax.experimental.pallas import tpu as pltpu


def _h_swish(x):
    return x * jnp.clip(x + 3.0, 0.0, 6.0) * (1.0 / 6.0)


def _rup(n, m):
    return ((n + m - 1) // m) * m


# --------------------------------------------------------------------------- fused kernel
def _block_kernel(x_ref, slab_ref, o_ref, *,
                  cin, e, d, cout, k, pad, tb, length,
                  r_wf, r_wv, r_wp, r_wpt, r_wd, e8,
                  relu, att, use_connect):
    """Whole Block forward for TB batch elements, lane-dense (C, TB*L) layout throughout."""
    f32 = jnp.float32
    tbl = tb * length

    def act(t):
        return jnp.maximum(t, 0.0) if relu else _h_swish(t)

    x = x_ref[0].astype(f32)                                            # (Cin, TB*L)

    # ---- conv: 1x1 conv (BN folded into weight/bias) + activation -------------------------
    w1 = slab_ref[pl.ds(0, e), pl.ds(0, cin)]
    b1 = slab_ref[pl.ds(0, e), pl.ds(cin, 1)]
    h = act(jnp.dot(w1, x, preferred_element_type=f32) + b1)            # (E, TB*L)

    # ---- depth_conv: depthwise conv(k) + Dropout(eval) + BN (folded), no activation -------
    # k XLU lane-rolls; per-tap weights carry the per-batch zero-padding edge mask (baked on
    # the host), so batch blocks never mix and the conv padding is exact.
    bd = slab_ref[pl.ds(0, e), pl.ds(cin + 1, 1)]
    dc = None
    for j in range(k):                                                  # static, k small
        wdm = slab_ref[pl.ds(r_wd + j * e8, e), pl.ds(0, tbl)]          # (E, TB*L)
        shift = (pad - j) % tbl
        hs = h if shift == 0 else pltpu.roll(h, shift=shift, axis=1)
        term = wdm * hs
        dc = term if dc is None else dc + term
    h = dc + bd                                                         # (E, TB*L)

    if att:
        # ---- Channel_attention / agca (if_gcu=False, head=1), eval mode -------------------
        # channel_fuse: 1x1 conv + BN(folded) + h_swish
        wf = slab_ref[pl.ds(r_wf, 4 * e), pl.ds(0, e)]
        bf = slab_ref[pl.ds(r_wf, 4 * e), pl.ds(e, 1)]
        y = _h_swish(jnp.dot(wf, h, preferred_element_type=f32) + bf)   # (4E, TB*L)
        # head==1: SDPA softmax over a size-1 key axis is identically 1, so att == v and the
        # q/k projections + LayerNorms cannot affect the output -> only v rows are used.
        wv = slab_ref[pl.ds(r_wv, d), pl.ds(0, 4 * e)]
        v = jnp.dot(wv, y, preferred_element_type=f32)                  # (d, TB*L)
        # torch att.view(B,1,d,L).permute(0,3,2,1).reshape(B,L,d) with L == d collapses (in
        # NCL layout) to a per-batch transpose of the (d, L) block: tb tiny trans_b matmuls.
        # TODO(synk): general length != d (and head > 1) would need the raw reshape shuffle.
        wp = slab_ref[pl.ds(r_wp, e), pl.ds(0, d)]
        bp = slab_ref[pl.ds(r_wp, e), pl.ds(d, 1)]
        pieces = []
        for b in range(tb):                                             # static, tb small
            vb = v[:, b * length:(b + 1) * length]                      # (d, L)
            pieces.append(lax.dot_general(wp, vb, (((1,), (1,)), ((), ())),
                                          preferred_element_type=f32))  # (E, L)
        h = _h_swish(jnp.concatenate(pieces, axis=1) + bp)              # (E, TB*L)

    # ---- point_conv: 1x1 conv + BN(folded) + activation -----------------------------------
    wpt = slab_ref[pl.ds(r_wpt, cout), pl.ds(0, e)]
    bpt = slab_ref[pl.ds(r_wpt, cout), pl.ds(e, 1)]
    o = act(jnp.dot(wpt, h, preferred_element_type=f32) + bpt)          # (Cout, TB*L)

    if use_connect:
        o = o + x
    o_ref[0] = o


# --------------------------------------------------------------------------- param packing
def _pack_params(p, *, kernel_size, pad, tb, length):
    """Pack all folded weights/biases into one (rows, >=128) f32 slab + static layout dict."""
    w1, wf, wv, wp, wpt = p["w1"], p["wf"], p["wv"], p["wp"], p["wpt"]
    b1, bd, bf, bp, bpt = p["b1"], p["bd"], p["bf"], p["bp"], p["bpt"]
    wd = p["wd"]                                         # (E, k), BN-folded depthwise taps
    E, Cin = w1.shape
    d = wv.shape[0]
    Cout = wpt.shape[0]
    k = kernel_size
    TBL = tb * length

    e8 = _rup(E, 8)
    r_wf = _rup(E, 8)
    r_wv = r_wf + _rup(4 * E, 8)
    r_wp = r_wv + _rup(d, 8)
    r_wpt = r_wp + _rup(E, 8)
    r_wd = r_wpt + _rup(Cout, 8)
    rows = r_wd + k * e8
    ncols = _rup(max(TBL, 4 * E, d + 1, E + 1, Cin + 2), 128)

    slab = np.zeros((rows, ncols), np.float32)
    slab[0:E, 0:Cin] = np.asarray(w1)
    slab[0:E, Cin] = np.asarray(b1)
    slab[0:E, Cin + 1] = np.asarray(bd)
    slab[r_wf:r_wf + 4 * E, 0:E] = np.asarray(wf)
    slab[r_wf:r_wf + 4 * E, E] = np.asarray(bf)
    slab[r_wv:r_wv + d, 0:4 * E] = np.asarray(wv)
    slab[r_wp:r_wp + E, 0:d] = np.asarray(wp)
    slab[r_wp:r_wp + E, d] = np.asarray(bp)
    slab[r_wpt:r_wpt + Cout, 0:E] = np.asarray(wpt)
    slab[r_wpt:r_wpt + Cout, E] = np.asarray(bpt)

    # depthwise taps with the per-batch zero-padding edge mask baked in (block-diag guard)
    wd_np = np.asarray(wd)
    lpos = np.arange(TBL) % length
    for j in range(k):
        src = lpos + j - pad
        mask = ((src >= 0) & (src < length)).astype(np.float32)          # (TB*L,)
        slab[r_wd + j * e8:r_wd + j * e8 + E, 0:TBL] = wd_np[:, j:j + 1] * mask[None, :]

    lay = dict(cin=Cin, e=E, d=d, cout=Cout, k=k, pad=pad, tb=tb, length=length,
               r_wf=r_wf, r_wv=r_wv, r_wp=r_wp, r_wpt=r_wpt, r_wd=r_wd, e8=e8)
    return jnp.asarray(slab), lay


# --------------------------------------------------------------------------- wrapper
def block_forward(x, folded, *, kernel_size=3, stride=1, non_linear="HS",
                  att=True, head=1, d=16):
    B, Cin, L = x.shape
    E = folded["w1"].shape[0]
    Cout = folded["wpt"].shape[0]
    if stride != 1:
        raise NotImplementedError("TODO(synk): stride > 1 depthwise conv not implemented")
    if att:
        assert head == 1, "TODO(synk): only head == 1 (agca default) is fused"
        assert L == d, "fused agca view-shuffle assumes length == agca.d (= 16)"
    pad = (kernel_size - 1) // 2
    use_connect = (stride == 1 and Cin == Cout)

    # Batch-tile: pack TB batch elements per grid step so activations are lane-dense.
    max_tb = max(1, 512 // L)
    TB = max(t for t in range(1, min(B, max_tb) + 1) if B % t == 0)
    G = B // TB
    TBL = TB * L

    slab, lay = _pack_params(folded, kernel_size=kernel_size, pad=pad, tb=TB, length=L)

    kern = functools.partial(_block_kernel, **lay, relu=(non_linear == "RE"),
                             att=att, use_connect=use_connect)

    # Wrapper-side layout plumbing: (B,C,L) -> (G, C, TB*L) lane-dense slabs (and back below).
    x_flat = x.reshape(G, TB, Cin, L).transpose(0, 2, 1, 3).reshape(G, Cin, TBL)

    flops = 2 * B * L * (E * Cin + E * kernel_size + 4 * E * E
                         + ((4 * E * d + E * d) if att else 0) + Cout * E)
    bytes_accessed = 4 * (B * Cin * L + B * Cout * L + int(np.prod(slab.shape)))

    out_flat = pl.pallas_call(
        kern,
        out_shape=jax.ShapeDtypeStruct((G, Cout, TBL), jnp.float32),
        grid=(G,),
        in_specs=[pl.BlockSpec((1, Cin, TBL), lambda g: (g, 0, 0)),
                  pl.BlockSpec(slab.shape, lambda g: (0, 0))],
        out_specs=pl.BlockSpec((1, Cout, TBL), lambda g: (g, 0, 0)),
        compiler_params=pltpu.CompilerParams(
            dimension_semantics=("parallel",),
            vmem_limit_bytes=32 * 1024 * 1024),
        cost_estimate=pl.CostEstimate(flops=flops, transcendentals=0,
                                      bytes_accessed=bytes_accessed),
    )(x_flat, slab)

    return out_flat.reshape(G, Cout, TB, L).transpose(0, 2, 1, 3).reshape(B, Cout, L)


# --------------------------------------------------------------------------- parameters
def init_raw_params(key, cin, cout, exp, *, kernel_size=3, head=1, d=16):
    """Raw (torch-layout) parameters for the eval-mode Block."""
    hd, c4 = head * d, 4 * exp
    it = iter(jax.random.split(key, 32))

    def nrm(shape, s=0.2):
        return s * jax.random.normal(next(it), shape, jnp.float32)

    def bn(c):
        return dict(g=1.0 + 0.1 * jax.random.normal(next(it), (c,), jnp.float32),
                    b=0.1 * jax.random.normal(next(it), (c,), jnp.float32),
                    m=0.1 * jax.random.normal(next(it), (c,), jnp.float32),
                    v=0.5 + jnp.abs(jax.random.normal(next(it), (c,), jnp.float32)))

    return dict(
        w1=nrm((exp, cin)), bn1=bn(exp),                              # conv (bias=False) + BN
        wd=nrm((exp, kernel_size)), bd=nrm((exp,), 0.1), bn2=bn(exp),  # depthwise + BN
        wf=nrm((c4, exp)), bf=nrm((c4,), 0.1), bnf=bn(c4),             # channel_fuse conv + BN
        wqkv=nrm((3 * hd, c4)),                                        # qkv Linear (no bias)
        lng=1.0 + 0.1 * jax.random.normal(next(it), (d,), jnp.float32),
        lnb=0.1 * jax.random.normal(next(it), (d,), jnp.float32),
        wp=nrm((exp, hd)), bp=nrm((exp,), 0.1),                        # proj Linear
        wpt=nrm((cout, exp)), bpt=nrm((cout,), 0.1), bnp=bn(cout),     # point conv + BN
    )


def fold_params(raw, *, head=1, d=16, eps=1e-5):
    """Fold eval-BatchNorms and conv biases into the adjacent weights (kernel operands)."""
    def ss(p):
        s = p["g"] / jnp.sqrt(p["v"] + eps)
        return s, p["b"] - p["m"] * s

    s1, t1 = ss(raw["bn1"])
    s2, t2 = ss(raw["bn2"])
    sf, tf = ss(raw["bnf"])
    sp, tp = ss(raw["bnp"])
    hd = head * d
    return dict(
        w1=raw["w1"] * s1[:, None], b1=t1,
        wd=raw["wd"] * s2[:, None], bd=raw["bd"] * s2 + t2,
        wf=raw["wf"] * sf[:, None], bf=raw["bf"] * sf + tf,
        wv=raw["wqkv"][2 * hd:3 * hd],                 # only v rows are live (head==1 SDPA)
        wp=raw["wp"], bp=raw["bp"],
        wpt=raw["wpt"] * sp[:, None], bpt=raw["bpt"] * sp + tp,
    )


# --------------------------------------------------------------------------- pure-JAX reference
def reference_forward(x, raw, *, kernel_size=3, stride=1, non_linear="HS",
                      att=True, head=1, d=16, eps=1e-5):
    """Faithful eval-mode math (incl. the full q/k/LayerNorm/SDPA path) for verification."""
    B, Cin, L = x.shape
    pad = (kernel_size - 1) // 2
    act = (lambda t: jnp.maximum(t, 0.0)) if non_linear == "RE" else _h_swish

    def bn(h, p):
        s = p["g"] / jnp.sqrt(p["v"] + eps)
        return (h - p["m"][:, None]) * s[:, None] + p["b"][:, None]

    h = act(bn(jnp.einsum("ec,bcl->bel", raw["w1"], x), raw["bn1"]))
    hp = jnp.pad(h, ((0, 0), (0, 0), (pad, pad)))
    dc = sum(hp[:, :, j:j + L] * raw["wd"][None, :, j, None] for j in range(kernel_size))
    h = bn(dc + raw["bd"][None, :, None], raw["bn2"])

    if att:
        y = _h_swish(bn(jnp.einsum("fe,bel->bfl", raw["wf"], h)
                        + raw["bf"][None, :, None], raw["bnf"]))
        y_cl = jnp.transpose(y, (0, 2, 1))                           # (B, L, 4E)
        qkv = jnp.einsum("blf,nf->bln", y_cl, raw["wqkv"]).reshape(B, L, 3, head, d)
        q, k, v = qkv[:, :, 0], qkv[:, :, 1], qkv[:, :, 2]

        def ln(t):
            mu = jnp.mean(t, axis=-1, keepdims=True)
            var = jnp.mean((t - mu) ** 2, axis=-1, keepdims=True)
            return (t - mu) / jnp.sqrt(var + eps) * raw["lng"] + raw["lnb"]

        q, k = ln(q), ln(k)
        q = q.reshape(B, head, L * d)
        k = k.reshape(B, head, L * d)
        v = v.reshape(B, head, L * d)
        s = jnp.einsum("bhe,bge->bhg", q, k) / math.sqrt(L * d)
        p = jax.nn.softmax(s, axis=-1)
        a = jnp.einsum("bhg,bge->bhe", p, v)
        a = a.reshape(B, head, d, L).transpose(0, 3, 2, 1).reshape(B, L, d * head)
        h = _h_swish(jnp.einsum("bld,ed->ble", a, raw["wp"]) + raw["bp"])
        h = jnp.transpose(h, (0, 2, 1))                              # (B, E, L)

    out = act(bn(jnp.einsum("oe,bel->bol", raw["wpt"], h)
                 + raw["bpt"][None, :, None], raw["bnp"]))
    if stride == 1 and Cin == out.shape[1]:
        out = out + x
    return out


# --------------------------------------------------------------------------- main
if __name__ == "__main__":
    key = jax.random.PRNGKey(0)
    kx, kp = jax.random.split(key)

    # Block(in_channels=4, out_channels=4, kernal_size=3, stride=1, nonLinear='HS',
    #       att=True, ifgca=False, head=1, exp_size=8); sequence length 16 (= agca.d).
    # Batch 8 so one grid step covers 8*16 = 128 lane-dense columns.
    B, Cin, Cout, L = 8, 4, 4, 16
    exp_size, kernel_size, stride, head, d = 8, 3, 1, 1, 16

    x = jax.random.normal(kx, (B, Cin, L), jnp.float32)
    raw = init_raw_params(kp, Cin, Cout, exp_size, kernel_size=kernel_size, head=head, d=d)
    folded = fold_params(raw, head=head, d=d)

    out = block_forward(x, folded, kernel_size=kernel_size, stride=stride,
                        non_linear="HS", att=True, head=head, d=d)
    out = jax.block_until_ready(out)

    ref = reference_forward(x, raw, kernel_size=kernel_size, stride=stride,
                            non_linear="HS", att=True, head=head, d=d)
    assert out.shape == (B, Cout, L)
    err = float(jnp.max(jnp.abs(out - ref)))
    assert jnp.allclose(out, ref, atol=5e-4, rtol=5e-4), err
    print("KERNEL_OK")
</pallas_src>

<mosaic_0001>
module attributes {stable_mosaic.version = 11 : i64} {
  func.func @_block_kernel(%arg0: i32, %arg1: memref<1x4x128xf32, #tpu.memory_space<vmem>>, %arg2: memref<96x128xf32, #tpu.memory_space<vmem>>, %arg3: memref<1x4x128xf32, #tpu.memory_space<vmem>>) attributes {dimension_semantics = [#tpu.dimension_semantics<parallel>], iteration_bounds = array<i64: 1>, scalar_prefetch = 0 : i64, scratch_operands = 0 : i64, tpu.core_type = #tpu.core_type<tc>, window_params = [{transform_indices = @transform_0, window_bounds = array<i64: 1, 4, 128>}, {pipeline_mode = #tpu.pipeline_mode<synchronous>, transform_indices = @transform_1, window_bounds = array<i64: 96, 128>}, {transform_indices = @transform_2, window_bounds = array<i64: 1, 4, 128>}]} {
    %c0 = arith.constant 0 : index
    %c0_0 = arith.constant 0 : index
    %c0_1 = arith.constant 0 : index
    %0 = vector.load %arg1[%c0, %c0_0, %c0_1] : memref<1x4x128xf32, #tpu.memory_space<vmem>>, vector<1x4x128xf32>
    %1 = vector.shape_cast %0 : vector<1x4x128xf32> to vector<4x128xf32>
    %c0_2 = arith.constant 0 : index
    %c0_3 = arith.constant 0 : index
    %2 = vector.load %arg2[%c0_2, %c0_3] : memref<96x128xf32, #tpu.memory_space<vmem>>, vector<8x4xf32>
    %c0_4 = arith.constant 0 : index
    %c4 = arith.constant 4 : index
    %3 = vector.load %arg2[%c0_4, %c4] : memref<96x128xf32, #tpu.memory_space<vmem>>, vector<8x1xf32>
    %cst = arith.constant dense<0.000000e+00> : vector<8x128xf32>
    %4 = tpu.matmul %2, %1, %cst {dimension_numbers = #tpu.dot_dimension_numbers<[1], [0], [0], [1], [0, 0, 1, 1], [], []>} : vector<8x4xf32>, vector<4x128xf32>, vector<8x128xf32> -> vector<8x128xf32>
    %5 = vector.broadcast %3 : vector<8x1xf32> to vector<8x128xf32>
    %6 = arith.addf %4, %5 : vector<8x128xf32>
    %cst_5 = arith.constant 3.000000e+00 : f32
    %7 = vector.broadcast %cst_5 : f32 to vector<8x128xf32>
    %8 = arith.addf %6, %7 : vector<8x128xf32>
    %cst_6 = arith.constant 0.000000e+00 : f32
    %cst_7 = arith.constant 6.000000e+00 : f32
    %9 = vector.broadcast %cst_6 : f32 to vector<8x128xf32>
    %10 = arith.maximumf %9, %8 : vector<8x128xf32>
    %11 = vector.broadcast %cst_7 : f32 to vector<8x128xf32>
    %12 = arith.minimumf %11, %10 : vector<8x128xf32>
    %13 = arith.mulf %6, %12 : vector<8x128xf32>
    %cst_8 = arith.constant 0.166666672 : f32
    %14 = vector.broadcast %cst_8 : f32 to vector<8x128xf32>
    %15 = arith.mulf %13, %14 : vector<8x128xf32>
    %c0_9 = arith.constant 0 : index
    %c5 = arith.constant 5 : index
    %16 = vector.load %arg2[%c0_9, %c5] : memref<96x128xf32, #tpu.memory_space<vmem>>, vector<8x1xf32>
    %c72 = arith.constant 72 : index
    %c0_10 = arith.constant 0 : index
    %17 = vector.load %arg2[%c72, %c0_10] : memref<96x128xf32, #tpu.memory_space<vmem>>, vector<8x128xf32>
    %c1_i32 = arith.constant 1 : i32
    %18 = tpu.dynamic_rotate %15 by %c1_i32 dim 1 : vector<8x128xf32>, i32 -> vector<8x128xf32>
    %19 = arith.mulf %17, %18 : vector<8x128xf32>
    %c80 = arith.constant 80 : index
    %c0_11 = arith.constant 0 : index
    %20 = vector.load %arg2[%c80, %c0_11] : memref<96x128xf32, #tpu.memory_space<vmem>>, vector<8x128xf32>
    %21 = arith.mulf %20, %15 : vector<8x128xf32>
    %22 = arith.addf %19, %21 : vector<8x128xf32>
    %c88 = arith.constant 88 : index
    %c0_12 = arith.constant 0 : index
    %23 = vector.load %arg2[%c88, %c0_12] : memref<96x128xf32, #tpu.memory_space<vmem>>, vector<8x128xf32>
    %c127_i32 = arith.constant 127 : i32
    %24 = tpu.dynamic_rotate %15 by %c127_i32 dim 1 : vector<8x128xf32>, i32 -> vector<8x128xf32>
    %25 = arith.mulf %23, %24 : vector<8x128xf32>
    %26 = arith.addf %22, %25 : vector<8x128xf32>
    %27 = vector.broadcast %16 : vector<8x1xf32> to vector<8x128xf32>
    %28 = arith.addf %26, %27 : vector<8x128xf32>
    %c8 = arith.constant 8 : index
    %c0_13 = arith.constant 0 : index
    %29 = vector.load %arg2[%c8, %c0_13] : memref<96x128xf32, #tpu.memory_space<vmem>>, vector<32x8xf32>
    %c8_14 = arith.constant 8 : index
    %c8_15 = arith.constant 8 : index
    %30 = vector.load %arg2[%c8_14, %c8_15] : memref<96x128xf32, #tpu.memory_space<vmem>>, vector<32x1xf32>
    %cst_16 = arith.constant dense<0.000000e+00> : vector<32x128xf32>
    %31 = tpu.matmul %29, %28, %cst_16 {dimension_numbers = #tpu.dot_dimension_numbers<[1], [0], [0], [1], [0, 0, 1, 1], [], []>} : vector<32x8xf32>, vector<8x128xf32>, vector<32x128xf32> -> vector<32x128xf32>
    %32 = vector.broadcast %30 : vector<32x1xf32> to vector<32x128xf32>
    %33 = arith.addf %31, %32 : vector<32x128xf32>
    %cst_17 = arith.constant 3.000000e+00 : f32
    %34 = vector.broadcast %cst_17 : f32 to vector<32x128xf32>
    %35 = arith.addf %33, %34 : vector<32x128xf32>
    %cst_18 = arith.constant 0.000000e+00 : f32
    %cst_19 = arith.constant 6.000000e+00 : f32
    %36 = vector.broadcast %cst_18 : f32 to vector<32x128xf32>
    %37 = arith.maximumf %36, %35 : vector<32x128xf32>
    %38 = vector.broadcast %cst_19 : f32 to vector<32x128xf32>
    %39 = arith.minimumf %38, %37 : vector<32x128xf32>
    %40 = arith.mulf %33, %39 : vector<32x128xf32>
    %cst_20 = arith.constant 0.166666672 : f32
    %41 = vector.broadcast %cst_20 : f32 to vector<32x128xf32>
    %42 = arith.mulf %40, %41 : vector<32x128xf32>
    %c40 = arith.constant 40 : index
    %c0_21 = arith.constant 0 : index
    %43 = vector.load %arg2[%c40, %c0_21] : memref<96x128xf32, #tpu.memory_space<vmem>>, vector<16x32xf32>
    %cst_22 = arith.constant dense<0.000000e+00> : vector<16x128xf32>
    %44 = tpu.matmul %43, %42, %cst_22 {dimension_numbers = #tpu.dot_dimension_numbers<[1], [0], [0], [1], [0, 0, 1, 1], [], []>} : vector<16x32xf32>, vector<32x128xf32>, vector<16x128xf32> -> vector<16x128xf32>
    %c56 = arith.constant 56 : index
    %c0_23 = arith.constant 0 : index
    %45 = vector.load %arg2[%c56, %c0_23] : memref<96x128xf32, #tpu.memory_space<vmem>>, vector<8x16xf32>
    %c56_24 = arith.constant 56 : index
    %c16 = arith.constant 16 : index
    %46 = vector.load %arg2[%c56_24, %c16] : memref<96x128xf32, #tpu.memory_space<vmem>>, vector<8x1xf32>
    %47 = vector.extract_strided_slice %44 {offsets = [0, 0], sizes = [16, 16], strides = [1, 1]} : vector<16x128xf32> to vector<16x16xf32>
    %cst_25 = arith.constant dense<0.000000e+00> : vector<8x16xf32>
    %48 = tpu.matmul %45, %47, %cst_25 {dimension_numbers = #tpu.dot_dimension_numbers<[1], [1], [0], [0], [0, 0, 1, 0], [], []>} : vector<8x16xf32>, vector<16x16xf32>, vector<8x16xf32> -> vector<8x16xf32>
    %49 = vector.extract_strided_slice %44 {offsets = [0, 16], sizes = [16, 16], strides = [1, 1]} : vector<16x128xf32> to vector<16x16xf32>
    %cst_26 = arith.constant dense<0.000000e+00> : vector<8x16xf32>
    %50 = tpu.matmul %45, %49, %cst_26 {dimension_numbers = #tpu.dot_dimension_numbers<[1], [1], [0], [0], [0, 0, 1, 0], [], []>} : vector<8x16xf32>, vector<16x16xf32>, vector<8x16xf32> -> vector<8x16xf32>
    %51 = vector.extract_strided_slice %44 {offsets = [0, 32], sizes = [16, 16], strides = [1, 1]} : vector<16x128xf32> to vector<16x16xf32>
    %cst_27 = arith.constant dense<0.000000e+00> : vector<8x16xf32>
    %52 = tpu.matmul %45, %51, %cst_27 {dimension_numbers = #tpu.dot_dimension_numbers<[1], [1], [0], [0], [0, 0, 1, 0], [], []>} : vector<8x16xf32>, vector<16x16xf32>, vector<8x16xf32> -> vector<8x16xf32>
    %53 = vector.extract_strided_slice %44 {offsets = [0, 48], sizes = [16, 16], strides = [1, 1]} : vector<16x128xf32> to vector<16x16xf32>
    %cst_28 = arith.constant dense<0.000000e+00> : vector<8x16xf32>
    %54 = tpu.matmul %45, %53, %cst_28 {dimension_numbers = #tpu.dot_dimension_numbers<[1], [1], [0], [0], [0, 0, 1, 0], [], []>} : vector<8x16xf32>, vector<16x16xf32>, vector<8x16xf32> -> vector<8x16xf32>
    %55 = vector.extract_strided_slice %44 {offsets = [0, 64], sizes = [16, 16], strides = [1, 1]} : vector<16x128xf32> to vector<16x16xf32>
    %cst_29 = arith.constant dense<0.000000e+00> : vector<8x16xf32>
    %56 = tpu.matmul %45, %55, %cst_29 {dimension_numbers = #tpu.dot_dimension_numbers<[1], [1], [0], [0], [0, 0, 1, 0], [], []>} : vector<8x16xf32>, vector<16x16xf32>, vector<8x16xf32> -> vector<8x16xf32>
    %57 = vector.extract_strided_slice %44 {offsets = [0, 80], sizes = [16, 16], strides = [1, 1]} : vector<16x128xf32> to vector<16x16xf32>
    %cst_30 = arith.constant dense<0.000000e+00> : vector<8x16xf32>
    %58 = tpu.matmul %45, %57, %cst_30 {dimension_numbers = #tpu.dot_dimension_numbers<[1], [1], [0], [0], [0, 0, 1, 0], [], []>} : vector<8x16xf32>, vector<16x16xf32>, vector<8x16xf32> -> vector<8x16xf32>
    %59 = vector.extract_strided_slice %44 {offsets = [0, 96], sizes = [16, 16], strides = [1, 1]} : vector<16x128xf32> to vector<16x16xf32>
    %cst_31 = arith.constant dense<0.000000e+00> : vector<8x16xf32>
    %60 = tpu.matmul %45, %59, %cst_31 {dimension_numbers = #tpu.dot_dimension_numbers<[1], [1], [0], [0], [0, 0, 1, 0], [], []>} : vector<8x16xf32>, vector<16x16xf32>, vector<8x16xf32> -> vector<8x16xf32>
    %61 = vector.extract_strided_slice %44 {offsets = [0, 112], sizes = [16, 16], strides = [1, 1]} : vector<16x128xf32> to vector<16x16xf32>
    %cst_32 = arith.constant dense<0.000000e+00> : vector<8x16xf32>
    %62 = tpu.matmul %45, %61, %cst_32 {dimension_numbers = #tpu.dot_dimension_numbers<[1], [1], [0], [0], [0, 0, 1, 0], [], []>} : vector<8x16xf32>, vector<16x16xf32>, vector<8x16xf32> -> vector<8x16xf32>
    %63 = tpu.concatenate %48, %50, %52, %54, %56, %58, %60, %62 in 1 : vector<8x16xf32>, vector<8x16xf32>, vector<8x16xf32>, vector<8x16xf32>, vector<8x16xf32>, vector<8x16xf32>, vector<8x16xf32>, vector<8x16xf32> -> vector<8x128xf32>
    %64 = vector.broadcast %46 : vector<8x1xf32> to vector<8x128xf32>
    %65 = arith.addf %63, %64 : vector<8x128xf32>
    %cst_33 = arith.constant 3.000000e+00 : f32
    %66 = vector.broadcast %cst_33 : f32 to vector<8x128xf32>
    %67 = arith.addf %65, %66 : vector<8x128xf32>
    %cst_34 = arith.constant 0.000000e+00 : f32
    %cst_35 = arith.constant 6.000000e+00 : f32
    %68 = vector.broadcast %cst_34 : f32 to vector<8x128xf32>
    %69 = arith.maximumf %68, %67 : vector<8x128xf32>
    %70 = vector.broadcast %cst_35 : f32 to vector<8x128xf32>
    %71 = arith.minimumf %70, %69 : vector<8x128xf32>
    %72 = arith.mulf %65, %71 : vector<8x128xf32>
    %cst_36 = arith.constant 0.166666672 : f32
    %73 = vector.broadcast %cst_36 : f32 to vector<8x128xf32>
    %74 = arith.mulf %72, %73 : vector<8x128xf32>
    %c64 = arith.constant 64 : index
    %c0_37 = arith.constant 0 : index
    %75 = vector.load %arg2[%c64, %c0_37] : memref<96x128xf32, #tpu.memory_space<vmem>>, vector<4x8xf32>
    %c64_38 = arith.constant 64 : index
    %c8_39 = arith.constant 8 : index
    %76 = vector.load %arg2[%c64_38, %c8_39] : memref<96x128xf32, #tpu.memory_space<vmem>>, vector<4x1xf32>
    %cst_40 = arith.constant dense<0.000000e+00> : vector<4x128xf32>
    %77 = tpu.matmul %75, %74, %cst_40 {dimension_numbers = #tpu.dot_dimension_numbers<[1], [0], [0], [1], [0, 0, 1, 1], [], []>} : vector<4x8xf32>, vector<8x128xf32>, vector<4x128xf32> -> vector<4x128xf32>
    %78 = vector.broadcast %76 : vector<4x1xf32> to vector<4x128xf32>
    %79 = arith.addf %77, %78 : vector<4x128xf32>
    %cst_41 = arith.constant 3.000000e+00 : f32
    %80 = vector.broadcast %cst_41 : f32 to vector<4x128xf32>
    %81 = arith.addf %79, %80 : vector<4x128xf32>
    %cst_42 = arith.constant 0.000000e+00 : f32
    %cst_43 = arith.constant 6.000000e+00 : f32
    %82 = vector.broadcast %cst_42 : f32 to vector<4x128xf32>
    %83 = arith.maximumf %82, %81 : vector<4x128xf32>
    %84 = vector.broadcast %cst_43 : f32 to vector<4x128xf32>
    %85 = arith.minimumf %84, %83 : vector<4x128xf32>
    %86 = arith.mulf %79, %85 : vector<4x128xf32>
    %cst_44 = arith.constant 0.166666672 : f32
    %87 = vector.broadcast %cst_44 : f32 to vector<4x128xf32>
    %88 = arith.mulf %86, %87 : vector<4x128xf32>
    %89 = arith.addf %88, %1 : vector<4x128xf32>
    %c0_45 = arith.constant 0 : index
    %c0_46 = arith.constant 0 : index
    %c0_47 = arith.constant 0 : index
    %90 = vector.load %arg3[%c0_45, %c0_46, %c0_47] : memref<1x4x128xf32, #tpu.memory_space<vmem>>, vector<1x4x128xf32>
    %91 = vector.shape_cast %90 : vector<1x4x128xf32> to vector<4x128xf32>
    %92 = vector.shape_cast %89 : vector<4x128xf32> to vector<1x4x128xf32>
    tpu.vector_store %arg3[%c0_45, %c0_46, %c0_47], %92 {strides = array<i32>} : memref<1x4x128xf32, #tpu.memory_space<vmem>>, vector<1x4x128xf32>,
    return
  }
  func.func @transform_0(%arg0: i32) -> (i32, i32, i32) {
    %c0_i32 = arith.constant 0 : i32
    %c0_i32_0 = arith.constant 0 : i32
    %c0_i32_1 = arith.constant 0 : i32
    return %arg0, %c0_i32, %c0_i32_0 : i32, i32, i32
  }
  func.func @transform_1(%arg0: i32) -> (i32, i32) {
    %c0_i32 = arith.constant 0 : i32
    %c0_i32_0 = arith.constant 0 : i32
    %c0_i32_1 = arith.constant 0 : i32
    return %c0_i32, %c0_i32_0 : i32, i32
  }
  func.func @transform_2(%arg0: i32) -> (i32, i32, i32) {
    %c0_i32 = arith.constant 0 : i32
    %c0_i32_0 = arith.constant 0 : i32
    %c0_i32_1 = arith.constant 0 : i32
    return %arg0, %c0_i32, %c0_i32_0 : i32, i32, i32
  }
}

</mosaic_0001>

<bundles_post_ra>
// kernel: tpu_custom_call.1
= control target key start
LH: loop header
LB: loop body
LE: loop exit
PB: predicated region body
PF: predicated region fallthrough
CT: control target
= control target key end

     0   :  { %7 = vsyncpa [#allocation3], 0  ;;  %s1655_s0 = inlined_call_operand.hbm [shape: f32[1,4,128], index: 0, kind: input, shape index: {}]   ;;  %s1656_s1 = inlined_call_operand.hbm [shape: f32[96,128], index: 1, kind: input, shape index: {}]   ;;  %s1657_s2 = inlined_call_operand.hbm [shape: f32[1,4,128], index: 2, kind: output, shape index: {}]  }
   0x1   :  { %8 = vsyncpa [#allocation6], 0 }
   0x2   :  { %9 = vsyncpa [#allocation4], 0  ;;  %s1475_s9 = smov [#allocation2]   ;;  %s1476_s11 = smov [#allocation5]  }
   0x3   :  { %s16_s10 = sshll.u32 %s1475_s9, 4  ;;  %s25_s12 = sshll.u32 %s1476_s11, 4  ;;  %s17_s10 = int_to_ptr.vmem [resolvable:$true] %s16_s10  ;;  %s1511_s12 = int_to_ptr.vmem [resolvable:$true] %s25_s12 }
   0x4   :  { %s1403_s15 = scalar_lea.hbm %s1655_s0, 64 }
   0x5   :  { %p1404_p0 = scmp.ne.s32.totalorder %s1655_s0, %s1403_s15  ;;  %p1407_p1 = scmp.lt.u32.totalorder %s1403_s15, %s1655_s0 }
   0x7   :  { %p1409_p2 = pnand %p1407_p1, %p1404_p0 }
   0x9   :  { %1412 = shalt.err (!%p1409_p2)
}
   0xa   :  { %s1413_s20 = scalar_lea.vmem %s17_s10, 64  ;;  %p1418_p4 = scmp.lt.s32.totalorder %s17_s10, %s17_s10 }
   0xb   :  { %p1414_p3 = scmp.ne.s32.totalorder %s17_s10, %s1413_s20  ;;  %p1419_p5 = scmp.lt.s32.totalorder %s1413_s20, %s1413_s20 }
   0xd   :  { %p1420_p6 = por %p1419_p5, %p1418_p4 }
   0xf   :  { %p1421_p7 = pnand %p1420_p6, %p1414_p3 }
  0x11   :  { %1424 = shalt.err (!%p1421_p7)
}
  0x12   :  { %19 = dma.hbm_to_vmem [thread:$0]  %s1655_s0, 64, %s17_s10, [#allocation3]  }
  0x13   :  { %s1425_s25 = scalar_lea.hbm %s1656_s1, 1536 }
  0x14   :  { %p1426_p8 = scmp.ne.s32.totalorder %s1656_s1, %s1425_s25  ;;  %p1429_p9 = scmp.lt.u32.totalorder %s1425_s25, %s1656_s1 }
  0x16   :  { %p1431_p10 = pnand %p1429_p9, %p1426_p8 }
  0x18   :  { %1434 = shalt.err (!%p1431_p10)
}
  0x19   :  { %s1435_s30 = scalar_lea.vmem %s1511_s12, 1536  ;;  %p1440_p12 = scmp.lt.s32.totalorder %s1511_s12, %s1511_s12 }
  0x1a   :  { %p1436_p11 = scmp.ne.s32.totalorder %s1511_s12, %s1435_s30  ;;  %p1441_p13 = scmp.lt.s32.totalorder %s1435_s30, %s1435_s30 }
  0x1c   :  { %p1442_p0 = por %p1441_p13, %p1440_p12 }
  0x1e   :  { %p1443_p1 = pnand %p1442_p0, %p1436_p11 }
  0x20   :  { %1446 = shalt.err (!%p1443_p1)
}
  0x21   :  { %s1477_s0 = smov 128   ;;  %s1478_s3 = smov 8  }
  0x22   :  { %31 = dma.hbm_to_vmem [thread:$0]  %s1656_s1, 1536, %s1511_s12, [#allocation6], %s1477_s0, %s1477_s0, %s1478_s3  }
  0x23   :  { %1469 = dma.done.wait [#allocation3], 64  }
  0x24   :  { %1470 = vsyncadd [#allocation3], 4294967232 }
  0x25   :  { %1471 = dma.done.wait [#allocation6], 1536  }
  0x26   :  { %1472 = vsyncadd [#allocation6], 4294965760  ;;  %v1479_v0 = vmov 0.0   ;;  %vm1480_vm0 = vmmov 0   ;;  %v1481_v1 = vmov 4   ;;  %vm48_vm1 = vcmask 1043456  }
  0x27   :  { %1216 = vmatprep.subr.mxu0 %v1479_v0  ;;  %1218 = vmatprep.mubr.msk.f32.mxu0 %vm1480_vm0, %v1479_v0  ;;  %vm45_vm2 = vcmask 31744   ;;  %v1545_v2 = vld [vmem:[#allocation2] sm:$0xf]  ;;  %v39_v3 = vld [vmem:[#allocation5] sm:$0xff]  ;;  %v1482_v4 = vmov 5   ;;  %v144_v13 = vld [vmem:[#allocation5 + $0x8] sm:$0xff] }
  0x28   :  { %1362 = vset.pattern.permute.xlu0 %v1481_v1  ;;  %1217 = vmatpush3.msk.msra.mxu0 %vm48_vm1, %v1545_v2  ;;  %vm168_vm3 = vcmask 64512   ;;  %s1483_s1 = smov 1   ;;  %s1484_s6 = smov 127   ;;  %v145_v15 = vld [vmem:[#allocation5 + $0x10] sm:$0xff]  ;;  %v1485_v16 = vmov 8   ;;  %v146_v17 = vld [vmem:[#allocation5 + $0x18] sm:$0xff] }
  0x29   :  { %42 = vperm.xlu0 %1362, %v39_v3   ;;  %1219 = vmatmul.mubr.msk.f32.vlgmr.msra.gmra.mrb[0].mxu0 %vm45_vm2, %v39_v3  ;;  %v147_v18 = vld [vmem:[#allocation5 + $0x20] sm:$0xff]  ;;  %v127_v19 = vld [vmem:[#allocation5 + $0x48] sm:$0xff]  ;;  %v131_v20 = vld [vmem:[#allocation5 + $0x50] sm:$0xff]  ;;  %vm284_vm4 = vcmask 261120   ;;  %vm367_vm5 = vcmask 130048   ;;  %s1487_s7 = smov 96  }
  0x2a   :  { %1223 = vmatprep.mubr.msk.f32.mxu1 %vm168_vm3, %v144_v13  ;;  %1364 = vset.pattern.permute.xlu1 %v1485_v16  ;;  %v134_v23 = vld [vmem:[#allocation5 + $0x58] sm:$0xff]  ;;  %v282_v31 = vld [vmem:[#allocation5 + $0x28] sm:$0xff]  ;;  %vm1564_vm6 = vmpackc.low %vm367_vm5, %vm367_vm5  ;;  %s1488_s8 = smov 112   ;;  %s1489_s9 = smov 64   ;;  %vm1023_vm7 = vcmask 392192   ;;  %vm1025_vm8 = vcmask 523264  }
  0x2b   :  { %1237 = vmatprep.mubr.msk.f32.mxu0 %vm284_vm4, %v282_v31  ;;  %s1490_s10 = smov 80   ;;  %s1491_s11 = smov 32   ;;  %vm1027_vm9 = vcmask 654336   ;;  %vm1029_vm10 = vcmask 785408   ;;  %vm1031_vm11 = vcmask 916480  }
  0x2c   :  { %s1492_s12 = smov 48   ;;  %s1493_s13 = smov 16  }
  0x2d   :  { %1363 = vset.pattern.permute.xlu0 %v1482_v4  ;;  %v283_v4 = vld [vmem:[#allocation5 + $0x30] sm:$0xff]  ;;  %s1495_s14 = smov [#allocation7]  }
  0x2e   :  { %140 = vperm.xlu0 %1363, %v39_v3   ;;  %s1134_s15 = sshll.u32 %s1495_s14, 4  ;;  %s1135_s15 = int_to_ptr.vmem [resolvable:$true] %s1134_s15 }
  0x2f   :  { %s1447_s16 = scalar_lea.vmem %s1135_s15, 64  ;;  %p1452_p3 = scmp.lt.s32.totalorder %s1135_s15, %s1135_s15 }
  0x30   :  { %p1448_p2 = scmp.ne.s32.totalorder %s1135_s15, %s1447_s16  ;;  %p1453_p4 = scmp.lt.s32.totalorder %s1447_s16, %s1447_s16 }
  0x32   :  { %1365 = vset.pattern.permute.xlu0 %v1485_v16  ;;  %p1454_p5 = por %p1453_p4, %p1452_p3 }
  0x33   :  { %155 = vperm.xlu0 %1365, %v145_v15  }
  0x34   :  { %p1455_p6 = pnand %p1454_p5, %p1448_p2 }
  0xa8   :  { %v43_v5 = vpop.permute.xlu0 %42 }
  0xad   :  { %v141_v28 = vpop.permute.xlu0 %140 }
  0xb2   :  { %v156_v34 = vpop.permute.xlu0 %155 }
  0xfc   :  { %v118_v6 = vpop.f32.mrb[0].mxu0 }
  0xfd   :  { %v119_v7 = vadd.f32 %v118_v6, %v43_v5  ;;  %v1220_v8 = vpop.f32.mrb[1].mxu0  ;;  %v1486_v5 = vmov 0.0|0.0  }
  0xff   :  { %v122_v9 = vadd.f32 3.0, %v119_v7 }
 0x101   :  { %v123_v10 = vmax.f32 %v122_v9, 0.0 }
 0x103   :  { %v124_v11 = vmin.f32 %v123_v10, 6.0 }
 0x105   :  { %v125_v12 = vmul.f32 %v124_v11, %v119_v7  ;;  %v1575_v11 = vld [vmem:[#allocation5 + $0x38] sm:$0xff] }
 0x107   :  { %v126_v14 = vmul.f32 0.16666667, %v125_v12  ;;  %v1494_v12 = vmov 16  }
 0x108   :  { %1401 = vset.pattern.permute.xlu0 %v1494_v12 }
 0x109   :  { %128 = vrot.lane.b32.xlu1 %v126_v14, %s1483_s1  ;;  %v132_v24 = vmul.f32 %v131_v20, %v126_v14 }
 0x10d   :  { %135 = vrot.lane.b32.xlu1 %v126_v14, %s1484_s6 }
 0x111   :  { %150 = vperm.xlu1 %1364, %v144_v13  }
 0x115   :  { %160 = vperm.xlu1 %1364, %v146_v17  }
 0x119   :  { %165 = vperm.xlu1 %1364, %v147_v18  }
 0x17b   :  { %v129_v21 = vpop.permute.xlu1 %128 }
 0x17c   :  { %v130_v22 = vmul.f32 %v129_v21, %v127_v19 }
 0x17e   :  { %v133_v26 = vadd.f32 %v132_v24, %v130_v22 }
 0x17f   :  { %v136_v25 = vpop.permute.xlu1 %135 }
 0x180   :  { %v137_v27 = vmul.f32 %v136_v25, %v134_v23 }
 0x182   :  { %v138_v29 = vadd.f32 %v137_v27, %v133_v26 }
 0x184   :  { %v143_v30 = vadd.f32 %v141_v28, %v138_v29 }
 0x186   :  { %1221 = vmatprep.subr.mxu1 %v143_v30 }
 0x187   :  { %1222 = vmatpush3.msra.mxu1 %v143_v30 }
 0x188   :  { %1224 = vmatmul.mubr.msk.f32.vlgmr.msra.gmra.mrb[0].mxu1 %vm168_vm3, %v145_v15  ;;  %1309 = vmatprep.subr.bf16.mxu1 %v1486_v5 }
 0x189   :  { %1226 = vmatprep.mubr.msk.f32.mxu1 %vm168_vm3, %v146_v17 }
 0x18c   :  { %1227 = vmatmul.mubr.msk.f32.gmra.mrb[2].mxu1 %vm168_vm3, %v147_v18 }
 0x18d   :  { %1244 = vmatprep.mubr.msk.f32.mxu1 %vm1480_vm0, %v1479_v0 }
 0x190   :  { %v151_v32 = vpop.permute.xlu1 %150 }
 0x194   :  { %v161_v33 = vpop.permute.xlu1 %160 }
 0x198   :  { %v166_v40 = vpop.permute.xlu1 %165 }
 0x25b   :  { %v1225_v35 = vpop.f32.mrb[0].mxu1 }
 0x25c   :  { %v249_v36 = vadd.f32 %v1225_v35, %v156_v34  ;;  %v243_v37 = vpop.f32.mrb[1].mxu1 }
 0x25d   :  { %v244_v38 = vadd.f32 %v243_v37, %v151_v32 }
 0x25e   :  { %v263_v39 = vadd.f32 3.0, %v249_v36 }
 0x25f   :  { %v262_v41 = vadd.f32 3.0, %v244_v38  ;;  %v1228_v42 = vpop.f32.mrb[2].mxu1 }
 0x260   :  { %v267_v43 = vmax.f32 %v263_v39, 0.0  ;;  %v259_v44 = vadd.f32 %v1228_v42, %v166_v40  ;;  %v253_v45 = vpop.f32.mrb[3].mxu1 }
 0x261   :  { %v266_v46 = vmax.f32 %v262_v41, 0.0  ;;  %v254_v47 = vadd.f32 %v253_v45, %v161_v33 }
 0x262   :  { %v271_v48 = vmin.f32 %v267_v43, 6.0  ;;  %v265_v49 = vadd.f32 3.0, %v259_v44 }
 0x263   :  { %v270_v50 = vmin.f32 %v266_v46, 6.0  ;;  %v264_v51 = vadd.f32 3.0, %v254_v47 }
 0x264   :  { %v275_v52 = vmul.f32 %v271_v48, %v249_v36  ;;  %v269_v53 = vmax.f32 %v265_v49, 0.0 }
 0x265   :  { %v274_v54 = vmul.f32 %v270_v50, %v244_v38  ;;  %v268_v55 = vmax.f32 %v264_v51, 0.0 }
 0x266   :  { %v279_v56 = vmul.f32 0.16666667, %v275_v52  ;;  %v273_v57 = vmin.f32 %v269_v53, 6.0 }
 0x267   :  { %v278_v58 = vmul.f32 0.16666667, %v274_v54  ;;  %v272_v59 = vmin.f32 %v268_v55, 6.0 }
 0x268   :  { %v277_v60 = vmul.f32 %v273_v57, %v259_v44 }
 0x269   :  { %v276_v61 = vmul.f32 %v272_v59, %v254_v47  ;;  %v1301_v62 = vpack.c.bf16 %v279_v56, %v278_v58  ;;  %v1043_v56 = vld [vmem:[#allocation5 + $0x40] sm:$0xf] }
 0x26a   :  { %v281_v63 = vmul.f32 0.16666667, %v277_v60 }
 0x26b   :  { %v280_v1 = vmul.f32 0.16666667, %v276_v61  ;;  %1302 = vmatprep.subr.bf16.mxu0 %v1301_v62 }
 0x26c   :  { %1304 = vmatpush3.bf16.msra.mxu0 %v1301_v62 }
 0x26d   :  { %v1305_v3 = vpack.c.bf16 %v281_v63, %v280_v1 }
 0x26f   :  { %1306 = vmatprep.subr.bf16.mxu0 %v1305_v3 }
 0x270   :  { %1308 = vmatpush3.bf16.msra.mxu0 %v1305_v3 }
 0x271   :  { %1313 = vmatprep.subr.bf16.mxu0 %v1486_v5 }
 0x273   :  { %1238 = vmatmul.mubr.msk.f32.vlgmr.msra.gmra.mrb[2].mxu0 %vm284_vm4, %v283_v4 }
 0x274   :  { %1251 = vmatprep.mubr.msk.f32.mxu0 %vm1480_vm0, %v1479_v0 }
 0x346   :  { %v1239_v6 = vpop.f32.mrb[2].mxu0 }
 0x347   :  { %v357_v7 = vpop.f32.mrb[3].mxu0 }
 0x348   :  { %v1371_v8 = vpack.i.bf16 %v1239_v6, %v357_v7  ;;  %v1310_v9 = vpack.c.bf16 %v1239_v6, %v357_v7 }
 0x34a   :  { %1372 = vrot.lane.b32.xlu1 %v1371_v8, %s1487_s7  ;;  %1367 = vrot.lane.b32.xlu0 %v1371_v8, %s1488_s8 }
 0x34b   :  { %1312 = vmatpush3.bf16.xpose.msk.msra.mxu1 %vm1564_vm6, %v1310_v9 }
 0x34c   :  { %1317 = vmatprep.subr.bf16.mxu1 %v1486_v5 }
 0x34e   :  { %1382 = vrot.lane.b32.xlu1 %v1371_v8, %s1489_s9  ;;  %1377 = vrot.lane.b32.xlu0 %v1371_v8, %s1490_s10 }
 0x352   :  { %1392 = vrot.lane.b32.xlu1 %v1371_v8, %s1491_s11  ;;  %1387 = vrot.lane.b32.xlu0 %v1371_v8, %s1492_s12 }
 0x353   :  { %1245 = vmatmul.mubr.msk.f32.vlgmr.msra.gmra.mrb[4].mxu1 %vm367_vm5, %v1575_v11 }
 0x354   :  { %1258 = vmatprep.mubr.msk.f32.mxu1 %vm1480_vm0, %v1479_v0 }
 0x356   :  { %1397 = vrot.lane.b32.xlu0 %v1371_v8, %s1493_s13 }
 0x35a   :  { %1034 = vperm.xlu0 %1401, %v1575_v11  }
 0x35e   :  { %1402 = vset.pattern.permute.xlu0 %v1485_v16 }
 0x3bc   :  { %v1373_v13 = vpop.permute.xlu1 %1372  ;;  %v1368_v14 = vpop.permute.xlu0 %1367 }
 0x3bd   :  { %v1375_v15 = vunpack.i.h.bf16 %v1373_v13  ;;  %v1374_v17 = vunpack.i.l.bf16 %v1373_v13  ;;  %v1370_v18 = vunpack.i.h.bf16 %v1368_v14  ;;  %v1369_v19 = vunpack.i.l.bf16 %v1368_v14 }
 0x3bf   :  { %v1318_v20 = vpack.c.bf16 %v1375_v15, %v1374_v17  ;;  %v1314_v21 = vpack.c.bf16 %v1370_v18, %v1369_v19 }
 0x3c0   :  { %v1383_v22 = vpop.permute.xlu1 %1382  ;;  %v1378_v23 = vpop.permute.xlu0 %1377 }
 0x3c1   :  { %1316 = vmatpush3.bf16.xpose.msk.msra.mxu0 %vm1564_vm6, %v1314_v21  ;;  %1320 = vmatpush3.bf16.xpose.msk.msra.mxu1 %vm1564_vm6, %v1318_v20  ;;  %v1385_v16 = vunpack.i.h.bf16 %v1383_v22  ;;  %v1384_v24 = vunpack.i.l.bf16 %v1383_v22  ;;  %v1380_v25 = vunpack.i.h.bf16 %v1378_v23  ;;  %v1379_v26 = vunpack.i.l.bf16 %v1378_v23 }
 0x3c2   :  { %1321 = vmatprep.subr.bf16.mxu0 %v1486_v5  ;;  %1325 = vmatprep.subr.bf16.mxu1 %v1486_v5 }
 0x3c3   :  { %v1326_v27 = vpack.c.bf16 %v1385_v16, %v1384_v24  ;;  %v1322_v28 = vpack.c.bf16 %v1380_v25, %v1379_v26 }
 0x3c4   :  { %v1393_v29 = vpop.permute.xlu1 %1392  ;;  %v1388_v30 = vpop.permute.xlu0 %1387 }
 0x3c5   :  { %v1395_v31 = vunpack.i.h.bf16 %v1393_v29  ;;  %v1394_v32 = vunpack.i.l.bf16 %v1393_v29  ;;  %v1390_v33 = vunpack.i.h.bf16 %v1388_v30  ;;  %v1389_v34 = vunpack.i.l.bf16 %v1388_v30 }
 0x3c7   :  { %v1334_v35 = vpack.c.bf16 %v1395_v31, %v1394_v32  ;;  %v1330_v36 = vpack.c.bf16 %v1390_v33, %v1389_v34 }
 0x3c8   :  { %1252 = vmatmul.mubr.msk.f32.vlgmr.msra.gmra.mrb[4].mxu0 %vm367_vm5, %v1575_v11  ;;  %1259 = vmatmul.mubr.msk.f32.vlgmr.msra.gmra.mrb[6].mxu1 %vm367_vm5, %v1575_v11  ;;  %v1398_v37 = vpop.permute.xlu0 %1397 }
 0x3c9   :  { %1324 = vmatpush3.bf16.xpose.msk.msra.mxu0 %vm1564_vm6, %v1322_v28  ;;  %1328 = vmatpush3.bf16.xpose.msk.msra.mxu1 %vm1564_vm6, %v1326_v27  ;;  %v1400_v38 = vunpack.i.h.bf16 %v1398_v37  ;;  %v1399_v39 = vunpack.i.l.bf16 %v1398_v37 }
 0x3ca   :  { %1265 = vmatprep.mubr.msk.f32.mxu0 %vm1480_vm0, %v1479_v0  ;;  %1272 = vmatprep.mubr.msk.f32.mxu1 %vm1480_vm0, %v1479_v0 }
 0x3cb   :  { %1329 = vmatprep.subr.bf16.mxu0 %v1486_v5  ;;  %1333 = vmatprep.subr.bf16.mxu1 %v1486_v5  ;;  %v1338_v40 = vpack.c.bf16 %v1400_v38, %v1399_v39 }
 0x3d0   :  { %1266 = vmatmul.mubr.msk.f32.vlgmr.msra.gmra.mrb[6].mxu0 %vm367_vm5, %v1575_v11  ;;  %1273 = vmatmul.mubr.msk.f32.vlgmr.msra.gmra.mrb[8].mxu1 %vm367_vm5, %v1575_v11 }
 0x3d1   :  { %1332 = vmatpush3.bf16.xpose.msk.msra.mxu0 %vm1564_vm6, %v1330_v36  ;;  %1336 = vmatpush3.bf16.xpose.msk.msra.mxu1 %vm1564_vm6, %v1334_v35 }
 0x3d2   :  { %1279 = vmatprep.mubr.msk.f32.mxu0 %vm1480_vm0, %v1479_v0  ;;  %1286 = vmatprep.mubr.msk.f32.mxu1 %vm1480_vm0, %v1479_v0 }
 0x3d3   :  { %1337 = vmatprep.subr.bf16.mxu0 %v1486_v5  ;;  %1296 = vmatprep.subr.mxu1 %v1479_v0 }
 0x3d8   :  { %1280 = vmatmul.mubr.msk.f32.vlgmr.msra.gmra.mrb[8].mxu0 %vm367_vm5, %v1575_v11  ;;  %1287 = vmatmul.mubr.msk.f32.vlgmr.msra.gmra.mrb[10].mxu1 %vm367_vm5, %v1575_v11 }
 0x3d9   :  { %1340 = vmatpush3.bf16.xpose.msk.msra.mxu0 %vm1564_vm6, %v1338_v40  ;;  %1293 = vmatprep.mubr.msk.f32.mxu0 %vm1480_vm0, %v1479_v0  ;;  %v1035_v59 = vpop.permute.xlu0 %1034 }
 0x3da   :  { %1298 = vmatprep.mubr.msk.f32.mxu1 %vm1480_vm0, %v1479_v0 }
 0x3e0   :  { %1294 = vmatmul.mubr.msk.f32.vlgmr.msra.gmra.mrb[10].mxu0 %vm367_vm5, %v1575_v11 }
 0x426   :  { %v443_v41 = vpop.f32.mrb[4].mxu1 }
 0x427   :  { %v1246_v42 = vpop.f32.mrb[5].mxu1 }
 0x49b   :  { %v521_v43 = vpop.f32.mrb[4].mxu0  ;;  %v599_v44 = vpop.f32.mrb[6].mxu1 }
 0x49c   :  { %994 = vrot.lane.b32.xlu1 %v521_v43, %s1493_s13  ;;  %v1253_v45 = vpop.f32.mrb[5].mxu0  ;;  %v1260_v46 = vpop.f32.mrb[7].mxu1 }
 0x4a0   :  { %998 = vrot.lane.b32.xlu1 %v599_v44, %s1491_s11 }
 0x4a3   :  { %v677_v47 = vpop.f32.mrb[6].mxu0  ;;  %v755_v48 = vpop.f32.mrb[8].mxu1 }
 0x4a4   :  { %v1267_v49 = vpop.f32.mrb[7].mxu0  ;;  %1002 = vrot.lane.b32.xlu1 %v677_v47, %s1492_s12  ;;  %1006 = vrot.lane.b32.xlu0 %v755_v48, %s1489_s9  ;;  %v1274_v0 = vpop.f32.mrb[9].mxu1 }
 0x4ab   :  { %v833_v50 = vpop.f32.mrb[8].mxu0  ;;  %v911_v51 = vpop.f32.mrb[10].mxu1 }
 0x4ac   :  { %v1281_v52 = vpop.f32.mrb[9].mxu0  ;;  %1010 = vrot.lane.b32.xlu1 %v833_v50, %s1490_s10  ;;  %1014 = vrot.lane.b32.xlu0 %v911_v51, %s1487_s7  ;;  %v1288_v53 = vpop.f32.mrb[11].mxu1 }
 0x4b0   :  { %1046 = vperm.xlu0 %1402, %v1043_v56  }
 0x4b3   :  { %v989_v54 = vpop.f32.mrb[10].mxu0 }
 0x4b4   :  { %v1295_v55 = vpop.f32.mrb[11].mxu0  ;;  %1018 = vrot.lane.b32.xlu1 %v989_v54, %s1488_s8 }
 0x50e   :  { %v995_v57 = vpop.permute.xlu1 %994 }
 0x50f   :  { %v1021_v61 = vsel %vm367_vm5, %v443_v41, %v995_v57 }
 0x512   :  { %v999_v58 = vpop.permute.xlu1 %998 }
 0x513   :  { %v1022_v62 = vsel %vm284_vm4, %v1021_v61, %v999_v58 }
 0x516   :  { %v1003_v60 = vpop.permute.xlu1 %1002  ;;  %v1007_v1 = vpop.permute.xlu0 %1006 }
 0x517   :  { %v1024_v63 = vsel %vm1023_vm7, %v1022_v62, %v1003_v60 }
 0x518   :  { %v1026_v4 = vsel %vm1025_vm8, %v1024_v63, %v1007_v1 }
 0x51e   :  { %v1011_v3 = vpop.permute.xlu1 %1010  ;;  %v1015_v6 = vpop.permute.xlu0 %1014 }
 0x51f   :  { %v1028_v5 = vsel %vm1027_vm9, %v1026_v4, %v1011_v3 }
 0x520   :  { %v1030_v7 = vsel %vm1029_vm10, %v1028_v5, %v1015_v6 }
 0x526   :  { %v1019_v8 = vpop.permute.xlu1 %1018 }
 0x527   :  { %v1032_v9 = vsel %vm1031_vm11, %v1030_v7, %v1019_v8 }
 0x528   :  { %v1037_v10 = vadd.f32 %v1035_v59, %v1032_v9 }
 0x52a   :  { %v1038_v11 = vadd.f32 3.0, %v1037_v10 }
 0x52c   :  { %v1039_v12 = vmax.f32 %v1038_v11, 0.0 }
 0x52e   :  { %v1040_v13 = vmin.f32 %v1039_v12, 6.0 }
 0x52f   :  { %v1047_v17 = vpop.permute.xlu0 %1046 }
 0x530   :  { %v1041_v14 = vmul.f32 %v1040_v13, %v1037_v10 }
 0x532   :  { %v1042_v15 = vmul.f32 0.16666667, %v1041_v14 }
 0x534   :  { %1297 = vmatpush3.msra.mxu1 %v1042_v15 }
 0x535   :  { %1299 = vmatmul.mubr.msk.f32.vlgmr.msra.gmra.mrb[12].mxu1 %vm168_vm3, %v1043_v56 }
 0x608   :  { %v1117_v18 = vpop.f32.mrb[12].mxu1 }
 0x609   :  { %v1118_v19 = vadd.f32 %v1117_v18, %v1047_v17  ;;  %v1300_v20 = vpop.f32.mrb[13].mxu1 }
 0x60b   :  { %v1121_v21 = vadd.f32 3.0, %v1118_v19 }
 0x60d   :  { %v1122_v22 = vmax.f32 %v1121_v21, 0.0 }
 0x60f   :  { %v1123_v23 = vmin.f32 %v1122_v22, 6.0 }
 0x611   :  { %v1124_v16 = vmul.f32 %v1123_v23, %v1118_v19 }
 0x613   :  { %v1125_v24 = vmul.f32 0.16666667, %v1124_v16 }
 0x615   :  { %v1126_v25 = vadd.f32 %v1125_v24, %v1545_v2 }
 0x617   :  { %1127 = vst [vmem:[#allocation7] sm:$0xf] %v1126_v25 }
 0x618   :  { %1458 = shalt.err (!%p1455_p6)
}
 0x619   :  { %s1459_s19 = scalar_lea.hbm %s1657_s2, 64 }
 0x61a   :  { %p1460_p7 = scmp.ne.s32.totalorder %s1657_s2, %s1459_s19  ;;  %p1463_p8 = scmp.lt.u32.totalorder %s1459_s19, %s1657_s2 }
 0x61c   :  { %p1465_p9 = pnand %p1463_p8, %p1460_p7 }
 0x61e   :  { %1468 = shalt.err (!%p1465_p9)
}
 0x61f   :  { %1137 = dma.vmem_to_hbm [thread:$0]  %s1135_s15, 64, %s1657_s2, [#allocation4]  }
 0x620   :  { %1473 = dma.done.wait [#allocation4], 64  }
 0x621   :  { %1474 = vsyncadd [#allocation4], 4294967232 }
 0x622   :  { %1141 = vsyncpa [#allocation3], 1 }
 0x623   :  { %1142 = vsyncpa [#allocation6], 1 }
 0x624   :  { %1143 = vsyncpa [#allocation4], 1 }

</bundles_post_ra>
